<compile_context>
chip_gen: v5e
topology: v5e:2x2
jax: 0.10.0
libtpu: 0.0.40
codegen_flags: <defaults>
</compile_context>

<pallas_src>
import jax
import jax.numpy as jnp
from jax import lax
from jax.experimental import pallas as pl
from jax.experimental.pallas import tpu as pltpu


def _round_up(x, m):
    return ((x + m - 1) // m) * m


def _cdiv(a, b):
    return (a + b - 1) // b


def _vmem_budget_bytes():
    """Per-generation scoped-VMEM budget: physical VMEM minus 16 MiB headroom."""
    try:
        cap = int(pltpu.get_tpu_info().vmem_capacity_bytes)
    except Exception:
        cap = 64 * 1024 * 1024          # conservative fallback (v7x physical VMEM)
    return max(32 * 1024 * 1024, cap - 16 * 1024 * 1024)


# ---------------------------------------------------------------------------
# Path "matmul": table DMA'd once into a persistent VMEM scratch (single
# buffer); rows gathered with a one-hot MXU matmul into the dense output tile.
# ---------------------------------------------------------------------------
def _make_onehot_matmul_kernel(vocab):
    def kernel(ids_ref, table_hbm, out_ref, table_vmem, sem):
        # ids_ref: (tile, 1) int32 VMEM block; table_hbm: (V, H) raw HBM ref;
        # out_ref: dense (tile, H) VMEM block; table_vmem: persistent scratch.
        @pl.when(pl.program_id(0) == 0)
        def _():
            cp = pltpu.make_async_copy(table_hbm, table_vmem, sem)
            cp.start()
            cp.wait()

        ids = ids_ref[...]                                    # (tile, 1) int32
        tile = ids.shape[0]
        onehot = (lax.broadcasted_iota(jnp.int32, (tile, vocab), 1)
                  == ids).astype(table_vmem.dtype)            # (tile, V)
        # HIGHEST precision keeps the f32 gather numerically exact on the MXU
        # (one-hot times table reconstructs the row bit-for-bit with the
        # multi-pass f32 path); bf16 tables are exact either way.
        precision = (jax.lax.Precision.HIGHEST
                     if table_vmem.dtype == jnp.float32 else None)
        out_ref[...] = jnp.dot(
            onehot, table_vmem[...],
            preferred_element_type=jnp.float32,
            precision=precision,
        ).astype(out_ref.dtype)

    return kernel


# ---------------------------------------------------------------------------
# Path "loop": table resident in VMEM (single copy, DMA'd at step 0); rows
# gathered with dynamic-slice copies.  Middle path for vocabs too large for
# the one-hot matmul but still worth keeping resident.
# ---------------------------------------------------------------------------
def _make_loop_gather_kernel(tile):
    def kernel(ids_ref, table_hbm, out_ref, table_vmem, sem):
        # ids_ref: SMEM (scalar prefetch); table_hbm: (V, H) HBM ref;
        # out_ref: dense (tile, H) VMEM block; table_vmem: persistent scratch.
        @pl.when(pl.program_id(0) == 0)
        def _():
            cp = pltpu.make_async_copy(table_hbm, table_vmem, sem)
            cp.start()
            cp.wait()

        base = pl.program_id(0) * tile

        # TODO(synk): for bf16/int8 tables, bitcast rows to 32-bit containers
        #             so single-row copies stay sublane-aligned.
        def body(t, carry):
            tok = ids_ref[base + t]
            out_ref[pl.ds(t, 1), :] = table_vmem[pl.ds(tok, 1), :]
            return carry

        lax.fori_loop(0, tile, body, 0, unroll=8)

    return kernel


# ---------------------------------------------------------------------------
# Path "dma": table stays in HBM; each row is DMA'd directly into the output
# block (no staging buffer) with a deep in-flight window.
# ---------------------------------------------------------------------------
def _make_hbm_row_dma_kernel(tile, n_inflight):
    def kernel(ids_ref, table_hbm, out_ref, sems):
        # ids_ref: SMEM (scalar prefetch); table_hbm: (V, H) HBM ref;
        # out_ref: dense (tile, H) VMEM block; sems: (n_inflight,) DMA sems.
        base = pl.program_id(0) * tile

        def start_row(t, tok):
            pltpu.make_async_copy(
                table_hbm.at[pl.ds(tok, 1), :],
                out_ref.at[pl.ds(t, 1), :],
                sems.at[t % n_inflight]).start()

        def wait_row(t):
            # Dummy src index 0: only the copy shape matters for the wait.
            pltpu.make_async_copy(
                table_hbm.at[pl.ds(0, 1), :],
                out_ref.at[pl.ds(t, 1), :],
                sems.at[t % n_inflight]).wait()

        # Prime the window with n_inflight outstanding row fetches.
        @pl.loop(0, n_inflight)
        def _(t):
            start_row(t, ids_ref[base + t])

        # Steady state: every started DMA is waited inside this loop, so all
        # row DMAs into out_ref complete before the pipeline's HBM writeback.
        @pl.loop(0, tile)
        def _(t):
            refill = t + n_inflight
            do_refill = refill < tile
            # Hoist the SMEM id read above the wait (.wait() breaks the
            # SMEM sst->sld forwarding path); clamp keeps it in bounds.
            tok_next = ids_ref[base + jnp.where(do_refill, refill, 0)]
            wait_row(t)

            @pl.when(do_refill)
            def _():
                start_row(refill, tok_next)

    return kernel


# ---------------------------------------------------------------------------
# Wrapper (equivalent of TransferEmbedding.forward).
# ---------------------------------------------------------------------------
def transfer_embedding_forward(seq_ids, seq_len, embedding_table, *,
                               tile_tokens=1024, max_onehot_vocab=2048,
                               force_path=None):
    """Pallas equivalent of TransferEmbedding.forward: embedding(seq_ids)."""
    del seq_len  # unused by the PyTorch module's forward as well
    if force_path not in (None, "matmul", "loop", "dma"):
        raise ValueError(f"unknown force_path {force_path!r}")

    B, S = seq_ids.shape
    V, H = embedding_table.shape
    dtype = embedding_table.dtype
    itemsize = dtype.itemsize
    N = B * S

    # Clamp ids so a bad token id cannot drive an out-of-bounds row access.
    flat_ids = jnp.clip(seq_ids.reshape(-1).astype(jnp.int32), 0, V - 1)

    budget = _vmem_budget_bytes()
    table_bytes = V * H * itemsize
    gather_bytes = N * H * itemsize

    # Tokens per grid step: multiple of the dtype sublane tile (dense output
    # block), as large as possible (per-step overhead ~0.35us; 512-1024-row
    # blocks approach HBM roofline), capped so the double-buffered output
    # block uses at most ~1/4 of the VMEM budget.
    sub = max(8, 32 // itemsize)          # 8 f32 / 16 bf16 / 32 int8
    tile = max(sub, min(tile_tokens, _round_up(N, sub)))
    tile = _round_up(tile, sub)
    while tile > sub and 2 * tile * H * itemsize > budget // 4:
        tile = max(sub, _round_up(tile // 2, sub))

    # Path selection: keep the table VMEM-resident (single copy) only when it
    # fits the per-generation budget AND its one-time HBM read is not much
    # larger than the N*H bytes the gather actually needs (traffic gate).
    resident_fits = table_bytes + 2 * tile * H * itemsize + (4 << 20) <= budget
    resident_worth = table_bytes <= max(4 * gather_bytes, 1 << 20)
    if force_path is not None:
        path = force_path
    elif resident_fits and resident_worth and V <= max_onehot_vocab:
        path = "matmul"
    elif resident_fits and resident_worth:
        path = "loop"
    else:
        path = "dma"

    if path == "matmul":
        # Keep the (tile, V) one-hot intermediate modest.
        while tile > sub and tile * V * itemsize > (2 << 20):
            tile = max(sub, _round_up(tile // 2, sub))

    n_pad = _round_up(N, tile)
    if n_pad != N:
        flat_ids = jnp.pad(flat_ids, (0, n_pad - N))
    grid = (n_pad // tile,)
    out_shape = jax.ShapeDtypeStruct((n_pad, H), dtype)

    def cparams(sem):
        return pltpu.CompilerParams(dimension_semantics=sem,
                                    vmem_limit_bytes=budget)

    if path == "matmul":
        # ids delivered as a normal blocked VMEM (tile, 1) input (no
        # whole-array scalar prefetch needed on this path).
        ids_2d = flat_ids.reshape(n_pad, 1)
        out_flat = pl.pallas_call(
            _make_onehot_matmul_kernel(V),
            out_shape=out_shape,
            grid=grid,
            in_specs=[
                pl.BlockSpec((tile, 1), lambda i: (i, 0)),
                pl.BlockSpec(memory_space=pl.ANY),          # table in HBM
            ],
            out_specs=pl.BlockSpec((tile, H), lambda i: (i, 0)),
            scratch_shapes=[
                pltpu.VMEM((V, H), dtype),                  # resident table (1x)
                pltpu.SemaphoreType.DMA(()),
            ],
            compiler_params=cparams(("arbitrary",)),
        )(ids_2d, embedding_table)

    elif path == "loop":
        # TODO(synk): blocked-SMEM delivery of ids (full scalar prefetch pads
        #             the whole B*S id vector in SMEM; fine at these sizes, a
        #             scalability limit for very long sequences).
        out_flat = pl.pallas_call(
            _make_loop_gather_kernel(tile),
            out_shape=out_shape,
            grid_spec=pltpu.PrefetchScalarGridSpec(
                num_scalar_prefetch=1,                      # flat_ids -> SMEM
                grid=grid,
                in_specs=[pl.BlockSpec(memory_space=pl.ANY)],
                out_specs=pl.BlockSpec((tile, H), lambda i, ids: (i, 0)),
                scratch_shapes=[
                    pltpu.VMEM((V, H), dtype),              # resident table (1x)
                    pltpu.SemaphoreType.DMA(()),
                ]),
            compiler_params=cparams(("arbitrary",)),
        )(flat_ids, embedding_table)

    else:  # "dma"
        row_bytes = H * itemsize
        # Deep window: target >= 256 KB of row DMAs in flight, 8..64 rows,
        # never more rows than the tile holds.
        n_inflight = int(min(64, tile, max(8, _cdiv(256 * 1024, row_bytes))))
        n_inflight = max(1, min(n_inflight, tile))
        out_flat = pl.pallas_call(
            _make_hbm_row_dma_kernel(tile, n_inflight),
            out_shape=out_shape,
            grid_spec=pltpu.PrefetchScalarGridSpec(
                num_scalar_prefetch=1,                      # flat_ids -> SMEM
                grid=grid,
                in_specs=[pl.BlockSpec(memory_space=pl.ANY)],
                out_specs=pl.BlockSpec((tile, H), lambda i, ids: (i, 0)),
                scratch_shapes=[pltpu.SemaphoreType.DMA((n_inflight,))]),
            compiler_params=cparams(("parallel",)),
        )(flat_ids, embedding_table)

    return out_flat[:N].reshape(B, S, H)


if __name__ == "__main__":
    key = jax.random.PRNGKey(0)
    k_emb, k_ids = jax.random.split(key)

    # Small deterministic setup; the "pretrained" table is just initialized
    # in-script (checkpoint loading is host-side Python, not a kernel concern).
    B, S, V, H = 2, 8, 64, 128
    embedding_table = jax.random.normal(k_emb, (V, H), dtype=jnp.float32)
    seq_ids = jax.random.randint(k_ids, (B, S), 0, V, dtype=jnp.int32)
    seq_len = jnp.full((B,), S, dtype=jnp.int32)

    # Reference: nn.Embedding(seq_ids) == table[seq_ids]
    ref = jnp.take(embedding_table, seq_ids, axis=0)

    # Exercise every path explicitly so all three kernels are verified.
    out_mm = jax.block_until_ready(
        transfer_embedding_forward(seq_ids, seq_len, embedding_table,
                                   force_path="matmul"))
    assert out_mm.shape == (B, S, H)
    assert jnp.allclose(out_mm, ref, rtol=2e-2, atol=2e-2), "matmul path mismatch"

    out_loop = jax.block_until_ready(
        transfer_embedding_forward(seq_ids, seq_len, embedding_table,
                                   force_path="loop"))
    assert out_loop.shape == (B, S, H)
    assert jnp.allclose(out_loop, ref), "loop path mismatch"

    out_dma = jax.block_until_ready(
        transfer_embedding_forward(seq_ids, seq_len, embedding_table,
                                   force_path="dma"))
    assert out_dma.shape == (B, S, H)
    assert jnp.allclose(out_dma, ref), "dma path mismatch"

    # Auto path selection (picks the one-hot MXU path for this table size).
    out_auto = jax.block_until_ready(
        transfer_embedding_forward(seq_ids, seq_len, embedding_table))
    assert out_auto.shape == (B, S, H)
    assert jnp.allclose(out_auto, ref, rtol=2e-2, atol=2e-2), "auto path mismatch"

    print("KERNEL_OK")
</pallas_src>

<mosaic_0001>
module attributes {stable_mosaic.version = 11 : i64} {
  func.func @kernel(%arg0: i32, %arg1: memref<16x1xi32, #tpu.memory_space<vmem>>, %arg2: memref<64x128xf32, #tpu.memory_space<any>>, %arg3: memref<16x128xf32, #tpu.memory_space<vmem>>, %arg4: memref<64x128xf32, #tpu.memory_space<vmem>>, %arg5: memref<!tpu.dma_semaphore, #tpu.memory_space<semaphore_mem>>) attributes {dimension_semantics = [#tpu.dimension_semantics<arbitrary>], iteration_bounds = array<i64: 1>, scalar_prefetch = 0 : i64, scratch_operands = 2 : i64, tpu.core_type = #tpu.core_type<tc>, window_params = [{transform_indices = @transform_0, window_bounds = array<i64: 16, 1>}, {}, {transform_indices = @transform_2, window_bounds = array<i64: 16, 128>}]} {
    %c0_i32 = arith.constant 0 : i32
    %0 = arith.cmpi eq, %arg0, %c0_i32 : i32
    %1 = arith.extui %0 : i1 to i32
    %c0_i32_0 = arith.constant 0 : i32
    %2 = arith.cmpi ne, %1, %c0_i32_0 : i32
    scf.if %2 {
      tpu.enqueue_dma source(%arg2 : memref<64x128xf32, #tpu.memory_space<any>>) target(%arg4 : memref<64x128xf32, #tpu.memory_space<vmem>>) target_semaphore(%arg5 : memref<!tpu.dma_semaphore, #tpu.memory_space<semaphore_mem>>)
      tpu.wait_dma2 semaphore(%arg5 : memref<!tpu.dma_semaphore, #tpu.memory_space<semaphore_mem>>) src(%arg2 : memref<64x128xf32, #tpu.memory_space<any>>) dst(%arg4 : memref<64x128xf32, #tpu.memory_space<vmem>>)
    } else {
    }
    %c0 = arith.constant 0 : index
    %c0_1 = arith.constant 0 : index
    %3 = vector.load %arg1[%c0, %c0_1] : memref<16x1xi32, #tpu.memory_space<vmem>>, vector<16x1xi32>
    %4 = tpu.iota {dimensions = array<i32: 1>} : vector<16x64xi32>
    %5 = vector.broadcast %3 : vector<16x1xi32> to vector<16x64xi32>
    %6 = arith.cmpi eq, %4, %5 : vector<16x64xi32>
    %7 = arith.extui %6 : vector<16x64xi1> to vector<16x64xi32>
    %8 = arith.sitofp %7 : vector<16x64xi32> to vector<16x64xf32>
    %c0_2 = arith.constant 0 : index
    %c0_3 = arith.constant 0 : index
    %9 = vector.load %arg4[%c0_2, %c0_3] : memref<64x128xf32, #tpu.memory_space<vmem>>, vector<64x128xf32>
    %cst = arith.constant dense<0.000000e+00> : vector<16x128xf32>
    %10 = tpu.matmul %8, %9, %cst {dimension_numbers = #tpu.dot_dimension_numbers<[1], [0], [0], [1], [0, 0, 1, 1], [], []>, precision = #tpu.contract_precision<fp32>} : vector<16x64xf32>, vector<64x128xf32>, vector<16x128xf32> -> vector<16x128xf32>
    %c0_4 = arith.constant 0 : index
    %c0_5 = arith.constant 0 : index
    %11 = vector.load %arg3[%c0_4, %c0_5] : memref<16x128xf32, #tpu.memory_space<vmem>>, vector<16x128xf32>
    tpu.vector_store %arg3[%c0_4, %c0_5], %10 {strides = array<i32>} : memref<16x128xf32, #tpu.memory_space<vmem>>, vector<16x128xf32>,
    return
  }
  func.func @transform_0(%arg0: i32) -> (i32, i32) {
    %c0_i32 = arith.constant 0 : i32
    %c0_i32_0 = arith.constant 0 : i32
    return %arg0, %c0_i32 : i32, i32
  }
  func.func @transform_2(%arg0: i32) -> (i32, i32) {
    %c0_i32 = arith.constant 0 : i32
    %c0_i32_0 = arith.constant 0 : i32
    return %arg0, %c0_i32 : i32, i32
  }
}

</mosaic_0001>

<bundles_post_ra>
// kernel: tpu_custom_call.1
= control target key start
LH: loop header
LB: loop body
LE: loop exit
PB: predicated region body
PF: predicated region fallthrough
CT: control target
= control target key end

     0   :  { %7 = vsyncpa [#allocation5], 0  ;;  %s439_s12 = smov [#allocation2]   ;;  %s539_s0 = inlined_call_operand.vmem [shape: s32[16,1], index: 0, kind: input, shape index: {}]   ;;  %s540_s1 = inlined_call_operand.hbm [shape: f32[64,128], index: 1, kind: input, shape index: {}]   ;;  %s541_s2 = inlined_call_operand.hbm [shape: f32[16,128], index: 2, kind: output, shape index: {}]  }
   0x1   :  { %s21_s11 = sshll.u32 %s540_s1, 4  ;;  %s23_s13 = sshll.u32 %s439_s12, 4  ;;  %s22_s11 = int_to_ptr.hbm [resolvable:$true] %s21_s11  ;;  %s24_s13 = int_to_ptr.vmem [resolvable:$true] %s23_s13 }
   0x2   :  { %26 = dma.hbm_to_vmem [thread:$0]  %s22_s11, 1024, %s24_s13, [#allocation3] }
   0x3   :  { %435 = dma.done.wait [#allocation3], 1024 }
   0x4   :  { %436 = vsyncadd [#allocation3], 4294966272  ;;  %v440_v0 = vmov 0   ;;  %v30_v1 = vld [vmem:[%s539_s0] sm:$0xff]  ;;  %v53_v2 = vld [vmem:[#allocation2 + $0x38] sm:$0xff]  ;;  %v32_v51 = vlaneseq  ;;  %vm54_vm0 = vcmask 523264  }
   0x5   :  { %386 = vset.pattern.permute.xlu0 %v440_v0  ;;  %v466_v3 = vand.u32 4294901760, %v53_v2  ;;  %v52_v4 = vld [vmem:[#allocation2 + $0x30] sm:$0xff]  ;;  %v51_v5 = vld [vmem:[#allocation2 + $0x28] sm:$0xff]  ;;  %v50_v6 = vld [vmem:[#allocation2 + $0x20] sm:$0xff]  ;;  %v441_v54 = vmov 0.0   ;;  %s337_s20 = sshll.u32 %s541_s2, 4  ;;  %s338_s20 = int_to_ptr.hbm [resolvable:$true] %s337_s20 }
   0x6   :  { %35 = vperm.xlu0 %386, %v30_v1   ;;  %v468_v7 = vand.u32 4294901760, %v52_v4  ;;  %v470_v8 = vand.u32 4294901760, %v51_v5  ;;  %v472_v9 = vand.u32 4294901760, %v50_v6  ;;  %v49_v10 = vld [vmem:[#allocation2 + $0x18] sm:$0xff]  ;;  %v48_v11 = vld [vmem:[#allocation2 + $0x10] sm:$0xff]  ;;  %v47_v12 = vld [vmem:[#allocation2 + $0x8] sm:$0xff] }
   0x7   :  { %v111_v13 = vsub.f32 %v53_v2, %v466_v3  ;;  %219 = vmatpush.msra.mxu3 %v466_v3  ;;  %v476_v14 = vand.u32 4294901760, %v49_v10  ;;  %70 = vmatpush.msra.mxu0 %v466_v3  ;;  %v479_v15 = vand.u32 4294901760, %v48_v11  ;;  %v481_v16 = vand.u32 4294901760, %v47_v12  ;;  %v31_v23 = vld [vmem:[%s539_s0 + $0x8] sm:$0xff]  ;;  %v46_v45 = vld [vmem:[#allocation2] sm:$0xff]  ;;  %s442_s0 = smov [#allocation4]  }
   0x8   :  { %v117_v17 = vsub.f32 %v52_v4, %v468_v7  ;;  %v123_v18 = vsub.f32 %v51_v5, %v470_v8  ;;  %v129_v19 = vsub.f32 %v50_v6, %v472_v9  ;;  %v83_v46 = vand.u32 4294901760, %v46_v45  ;;  %s335_s17 = sshll.u32 %s442_s0, 4  ;;  %s443_s21 = smov 128   ;;  %s336_s17 = int_to_ptr.vmem [resolvable:$true] %s335_s17 }
   0x9   :  { %v112_v20 = vand.u32 4294901760, %v111_v13  ;;  %177 = vmatpush.msra.mxu2 %v111_v13  ;;  %221 = vmatpush.msra.mxu3 %v468_v7  ;;  %v135_v21 = vsub.f32 %v49_v10, %v476_v14  ;;  %v141_v22 = vsub.f32 %v48_v11, %v479_v15  ;;  %v147_v29 = vsub.f32 %v47_v12, %v481_v16  ;;  %s444_s22 = smov 8  }
   0xa   :  { %v118_v24 = vand.u32 4294901760, %v117_v17  ;;  %v124_v25 = vand.u32 4294901760, %v123_v18  ;;  %v492_v26 = vand.u32 4294901760, %v129_v19  ;;  %72 = vmatpush.msra.mxu0 %v468_v7  ;;  %v153_v47 = vsub.f32 %v46_v45, %v83_v46 }
   0xb   :  { %v113_v27 = vsub.f32 %v111_v13, %v112_v20  ;;  %180 = vmatpush.msra.mxu2 %v117_v17  ;;  %v495_v28 = vand.u32 4294901760, %v135_v21  ;;  %223 = vmatpush.msra.mxu3 %v470_v8  ;;  %v142_v34 = vand.u32 4294901760, %v141_v22  ;;  %v148_v38 = vand.u32 4294901760, %v147_v29 }
   0xc   :  { %v119_v30 = vsub.f32 %v117_v17, %v118_v24  ;;  %v125_v31 = vsub.f32 %v123_v18, %v124_v25  ;;  %74 = vmatpush.msra.mxu0 %v470_v8  ;;  %v131_v33 = vsub.f32 %v129_v19, %v492_v26  ;;  %v154_v48 = vand.u32 4294901760, %v153_v47 }
   0xd   :  { %v114_v32 = vand.u32 4294901760, %v113_v27  ;;  %183 = vmatpush.msra.mxu2 %v123_v18  ;;  %225 = vmatpush.msra.mxu3 %v472_v9  ;;  %v137_v37 = vsub.f32 %v135_v21, %v495_v28  ;;  %v143_v40 = vsub.f32 %v141_v22, %v142_v34  ;;  %v149_v42 = vsub.f32 %v147_v29, %v148_v38 }
   0xe   :  { %38 = vperm.xlu0 %386, %v31_v23   ;;  %v120_v35 = vand.u32 4294901760, %v119_v30  ;;  %76 = vmatpush.msra.mxu0 %v472_v9  ;;  %v126_v36 = vand.u32 4294901760, %v125_v31  ;;  %v132_v39 = vand.u32 4294901760, %v131_v33  ;;  %v155_v49 = vsub.f32 %v153_v47, %v154_v48 }
   0xf   :  { %115 = vmatpush.msra.mxu1 %v114_v32  ;;  %186 = vmatpush.msra.mxu2 %v129_v19  ;;  %v138_v41 = vand.u32 4294901760, %v137_v37  ;;  %v144_v43 = vand.u32 4294901760, %v143_v40  ;;  %v150_v44 = vand.u32 4294901760, %v149_v42  ;;  %v33_v52 = vand.u32 127, %v32_v51 }
  0x10   :  { %227 = vmatpush.msra.mxu3 %v476_v14  ;;  %78 = vmatpush.msra.mxu0 %v476_v14  ;;  %v156_v50 = vand.u32 4294901760, %v155_v49 }
  0x11   :  { %121 = vmatpush.msra.mxu1 %v120_v35  ;;  %189 = vmatpush.msra.mxu2 %v135_v21 }
  0x12   :  { %229 = vmatpush.msra.mxu3 %v479_v15  ;;  %80 = vmatpush.msra.mxu0 %v479_v15 }
  0x13   :  { %127 = vmatpush.msra.mxu1 %v126_v36  ;;  %192 = vmatpush.msra.mxu2 %v141_v22 }
  0x14   :  { %231 = vmatpush.msra.mxu3 %v481_v16  ;;  %82 = vmatpush.msra.mxu0 %v481_v16 }
  0x15   :  { %133 = vmatpush.msra.mxu1 %v132_v39  ;;  %195 = vmatpush.msra.mxu2 %v147_v29 }
  0x16   :  { %233 = vmatpush.msra.mxu3 %v83_v46  ;;  %84 = vmatpush.msra.mxu0 %v83_v46 }
  0x17   :  { %139 = vmatpush.msra.mxu1 %v138_v41  ;;  %198 = vmatpush.msra.mxu2 %v153_v47 }
  0x18   :  { %372 = vmatpush.msrb.mxu3 %v466_v3  ;;  %258 = vmatpush.msrb.mxu0 %v112_v20 }
  0x19   :  { %145 = vmatpush.msra.mxu1 %v144_v43  ;;  %364 = vmatpush.msrb.mxu2 %v112_v20 }
  0x1a   :  { %373 = vmatpush.msrb.mxu3 %v468_v7  ;;  %262 = vmatpush.msrb.mxu0 %v118_v24 }
  0x1b   :  { %151 = vmatpush.msra.mxu1 %v150_v44  ;;  %365 = vmatpush.msrb.mxu2 %v118_v24 }
  0x1c   :  { %374 = vmatpush.msrb.mxu3 %v470_v8  ;;  %266 = vmatpush.msrb.mxu0 %v124_v25 }
  0x1d   :  { %366 = vmatpush.msrb.mxu2 %v124_v25  ;;  %157 = vmatpush.msra.mxu1 %v156_v50 }
  0x1e   :  { %375 = vmatpush.msrb.mxu3 %v472_v9  ;;  %270 = vmatpush.msrb.mxu0 %v492_v26 }
  0x1f   :  { %305 = vmatpush.msrb.mxu1 %v466_v3  ;;  %367 = vmatpush.msrb.mxu2 %v492_v26 }
  0x20   :  { %376 = vmatpush.msrb.mxu3 %v476_v14  ;;  %274 = vmatpush.msrb.mxu0 %v495_v28 }
  0x21   :  { %307 = vmatpush.msrb.mxu1 %v468_v7  ;;  %368 = vmatpush.msrb.mxu2 %v495_v28 }
  0x22   :  { %377 = vmatpush.msrb.mxu3 %v479_v15  ;;  %278 = vmatpush.msrb.mxu0 %v142_v34 }
  0x23   :  { %309 = vmatpush.msrb.mxu1 %v470_v8  ;;  %369 = vmatpush.msrb.mxu2 %v142_v34 }
  0x24   :  { %378 = vmatpush.msrb.mxu3 %v481_v16  ;;  %282 = vmatpush.msrb.mxu0 %v148_v38 }
  0x25   :  { %311 = vmatpush.msrb.mxu1 %v472_v9  ;;  %370 = vmatpush.msrb.mxu2 %v148_v38 }
  0x26   :  { %379 = vmatpush.msrb.mxu3 %v83_v46  ;;  %286 = vmatpush.msrb.mxu0 %v154_v48 }
  0x27   :  { %313 = vmatpush.msrb.mxu1 %v476_v14  ;;  %371 = vmatpush.msrb.mxu2 %v154_v48 }
  0x29   :  { %315 = vmatpush.msrb.mxu1 %v479_v15 }
  0x2b   :  { %317 = vmatpush.msrb.mxu1 %v481_v16 }
  0x2d   :  { %319 = vmatpush.msrb.mxu1 %v83_v46 }
  0x78   :  { %v36_v53 = vpop.permute.xlu0 %35 }
  0x79   :  { %vm40_vm1 = vcmp.eq.s32.totalorder %v33_v52, %v36_v53 }
  0x7a   :  { %v355_v55 = vsel %vm40_vm1, 1.0, %v441_v54 }
  0x7b   :  { %357 = vmatmul.msk.f32.vlgmr.msra.gmra.mxu1 %vm54_vm0, %v355_v55  ;;  %v56_v56 = vsel %vm54_vm0, %v355_v55, 0 }
  0x7c   :  { %v86_v57 = vsub.f32 %v56_v56, %v56_v56 }
  0x7e   :  { %201 = vmatmul.f32.vlgmr.msra.gmra.mxu2 %v86_v57  ;;  %v87_v58 = vand.u32 4294901760, %v86_v57 }
  0x80   :  { %237 = vmatmul.f32.vlgmr.msra.gmra.mxu3 %v87_v58  ;;  %v39_v59 = vpop.permute.xlu0 %38  ;;  %v88_v60 = vsub.f32 %v86_v57, %v87_v58 }
  0x81   :  { %vm41_vm2 = vcmp.eq.s32.totalorder %v33_v52, %v39_v59 }
  0x82   :  { %v356_v61 = vsel %vm41_vm2, 1.0, %v441_v54  ;;  %v89_v62 = vand.u32 4294901760, %v88_v60 }
  0x83   :  { %358 = vmatmul.msk.f32.gmra.mxu1 %vm54_vm0, %v356_v61  ;;  %v59_v63 = vsel %vm54_vm0, %v356_v61, 0 }
  0x84   :  { %90 = vmatmul.f32.vlgmr.msra.gmra.mxu0 %v89_v62  ;;  %v94_v0 = vsub.f32 %v59_v63, %v59_v63 }
  0x86   :  { %206 = vmatmul.f32.gmra.mxu2 %v94_v0  ;;  %v95_v1 = vand.u32 4294901760, %v94_v0 }
  0x88   :  { %243 = vmatmul.f32.gmra.mxu3 %v95_v1  ;;  %v96_v2 = vsub.f32 %v94_v0, %v95_v1 }
  0x8a   :  { %v97_v3 = vand.u32 4294901760, %v96_v2 }
  0x8b   :  { %361 = vmatmul.msk.f32.vlgmr.msrb.gmra.mxu1 %vm54_vm0, %v355_v55 }
  0x8c   :  { %98 = vmatmul.f32.gmra.mxu0 %v97_v3 }
  0x8e   :  { %360 = vmatmul.msk.f32.vlgmr.msrb.gmra.mxu2 %vm54_vm0, %v356_v61 }
  0x90   :  { %362 = vmatmul.msk.f32.vlgmr.msrb.gmra.mxu3 %vm54_vm0, %v356_v61 }
  0x94   :  { %359 = vmatmul.msk.f32.vlgmr.msrb.gmra.mxu0 %vm54_vm0, %v355_v55 }
  0xf8   :  { %v160_v4 = vpop.f32.mrf.mxu1 }
 0x100   :  { %v164_v8 = vpop.f32.mrf.mxu1 }
 0x101   :  { %v91_v5 = vpop.f32.mrf.mxu0  ;;  %v202_v6 = vpop.f32.mrf.mxu2 }
 0x102   :  { %v161_v9 = vadd.f32 %v160_v4, %v91_v5 }
 0x103   :  { %v238_v7 = vpop.f32.mrf.mxu3 }
 0x104   :  { %v203_v14 = vadd.f32 %v202_v6, %v161_v9 }
 0x106   :  { %v239_v16 = vadd.f32 %v238_v7, %v203_v14 }
 0x108   :  { %v322_v22 = vpop.f32.mrf.mxu1 }
 0x109   :  { %v99_v10 = vpop.f32.mrf.mxu0  ;;  %v207_v11 = vpop.f32.mrf.mxu2 }
 0x10a   :  { %v165_v12 = vadd.f32 %v164_v8, %v99_v10 }
 0x10b   :  { %v244_v13 = vpop.f32.mrf.mxu3 }
 0x10c   :  { %v208_v15 = vadd.f32 %v207_v11, %v165_v12 }
 0x10e   :  { %v245_v17 = vadd.f32 %v244_v13, %v208_v15 }
 0x111   :  { %v289_v18 = vpop.f32.mrf.mxu0  ;;  %v293_v19 = vpop.f32.mrf.mxu2 }
 0x112   :  { %v290_v20 = vadd.f32 %v289_v18, %v239_v16  ;;  %v294_v21 = vadd.f32 %v293_v19, %v245_v17 }
 0x113   :  { %v326_v23 = vpop.f32.mrf.mxu3 }
 0x114   :  { %v323_v24 = vadd.f32 %v322_v22, %v290_v20  ;;  %v327_v25 = vadd.f32 %v326_v23, %v294_v21 }
 0x116   :  { %329 = vst [vmem:[#allocation4] sm:$0xff] %v323_v24 }
 0x117   :  { %330 = vst [vmem:[#allocation4 + $0x8] sm:$0xff] %v327_v25 }
 0x118   :  { %343 = dma.vmem_to_hbm [thread:$0]  %s336_s17, 256, %s338_s20, [#allocation5], %s443_s21, %s443_s21, %s444_s22  }
 0x119   :  { %437 = dma.done.wait [#allocation5], 256  }
 0x11a   :  { %438 = vsyncadd [#allocation5], 4294967040 }
 0x11b   :  { %348 = vsyncpa [#allocation5], 1 }
 0x11c   :  { %349 = vsyncmov [#allocation3] }
 0x11f   :  { %s350_s23 = vpop.sfrf %349 }
 0x120   :  { %p363_p0 = scmp.ne.s32.totalorder %s350_s23, 0 }
 0x122   :  { %354 = shalt.err (%p363_p0)  }

</bundles_post_ra>
